<compile_context>
chip_gen: v5e
topology: v5e:2x2
jax: 0.10.0
libtpu: 0.0.40
codegen_flags: <defaults>
</compile_context>

<pallas_src>
import functools
import math

import jax
import jax.numpy as jnp
from jax.experimental import pallas as pl
from jax.experimental.pallas import tpu as pltpu

LANE = 128
SUBLANE = 8


def _round_up(x, m):
    return (x + m - 1) // m * m


def gru_cell_kernel(xh_ref, h_ref, w_rz_ref, w_n_ref, b_rz_ref, b_n_ref,
                    h_out_ref, xn_ref, *, input_pad, hidden_pad):
    """One batch tile of the GRU cell.

    xh_ref : (bm, Ip+Hp) bf16   [x | h]
    h_ref  : (bm, Hp)     f32   h (full precision for gating / blend)
    w_rz   : (Ip+Hp, 2Hp) bf16  [[Wx_r | Wx_z], [Wh_r | Wh_z]]
    w_n    : (Ip+Hp, Hp)  bf16  [Wx_h ; Wh_h]
    b_rz   : (1, 2Hp)     f32   (bx_rz + bh_rz)
    b_n    : (1, Hp)      f32   (bx_h + bh_h)
    xn_ref : (bm, Ip+Hp) bf16   scratch for [x | h*r]
    """
    Hp = hidden_pad
    xh = xh_ref[...]            # bf16
    h = h_ref[...]              # f32

    # --- r / z gates: one fused MXU dot, f32 accumulation -------------------
    rz = jnp.dot(xh, w_rz_ref[...], preferred_element_type=jnp.float32)
    rz = rz + b_rz_ref[...]
    r = jax.nn.sigmoid(rz[:, :Hp])
    z = jax.nn.sigmoid(rz[:, Hp:])

    # --- candidate: build [x | h*r] in scratch, one fused MXU dot -----------
    xn_ref[...] = xh
    xn_ref[:, input_pad:] = (h * r).astype(xh.dtype)
    cand = jnp.tanh(
        jnp.dot(xn_ref[...], w_n_ref[...], preferred_element_type=jnp.float32)
        + b_n_ref[...]
    )

    # h' = z*h + (1-z)*cand  ==  cand + z*(h - cand)
    h_out_ref[...] = (cand + z * (h - cand)).astype(h_out_ref.dtype)


def gru_cell_forward(x, h, params, *, block_b=None, param_dtype=jnp.bfloat16):
    """One GRU cell step. x: (B, input_size), h: (B, hidden_size) -> (B, hidden_size)."""
    B, I = x.shape
    H = h.shape[-1]

    Ip = _round_up(I, LANE)
    Hp = _round_up(H, LANE)
    if block_b is None:
        block_b = min(128, _round_up(B, SUBLANE))
    Bp = _round_up(B, block_b)
    K = Ip + Hp

    f32 = jnp.float32

    def pad2(a, rows, cols):
        return jnp.pad(a, ((0, rows - a.shape[0]), (0, cols - a.shape[1])))

    # --- fuse + pad weights (plain JAX, outside the kernel) ------------------
    def fuse_rz(w_x, w_h):
        # w_x: (I, 2H), w_h: (H, 2H); columns are [r | z].
        blocks = []
        for w, rows in ((w_x, Ip), (w_h, Hp)):
            r_blk = pad2(w[:, :H], rows, Hp)
            z_blk = pad2(w[:, H:], rows, Hp)
            blocks.append(jnp.concatenate([r_blk, z_blk], axis=1))
        return jnp.concatenate(blocks, axis=0)                       # (K, 2Hp)

    w_rz = fuse_rz(params["w_x_rz"], params["w_h_rz"]).astype(param_dtype)
    w_n = jnp.concatenate(
        [pad2(params["w_x_h"], Ip, Hp), pad2(params["w_h_h"], Hp, Hp)], axis=0
    ).astype(param_dtype)                                            # (K, Hp)

    def pad_rz_bias(b):                                              # (2H,) -> (2Hp,)
        return jnp.concatenate([jnp.pad(b[:H], (0, Hp - H)),
                                jnp.pad(b[H:], (0, Hp - H))])

    b_rz = (pad_rz_bias(params["b_x_rz"]) + pad_rz_bias(params["b_h_rz"]))
    b_rz = b_rz.reshape(1, 2 * Hp).astype(f32)
    b_n = jnp.pad(params["b_x_h"] + params["b_h_h"], (0, Hp - H))
    b_n = b_n.reshape(1, Hp).astype(f32)

    # --- pad activations; [x | h] slab in bf16, h kept separately in f32 -----
    xp = jnp.pad(x.astype(f32), ((0, Bp - B), (0, Ip - I)))
    hp = jnp.pad(h.astype(f32), ((0, Bp - B), (0, Hp - H)))
    xh = jnp.concatenate([xp, hp], axis=1).astype(param_dtype)       # (Bp, K)

    grid = (Bp // block_b,)
    kernel = functools.partial(gru_cell_kernel, input_pad=Ip, hidden_pad=Hp)

    out = pl.pallas_call(
        kernel,
        out_shape=jax.ShapeDtypeStruct((Bp, Hp), f32),
        grid_spec=pltpu.PrefetchScalarGridSpec(
            num_scalar_prefetch=0,
            grid=grid,
            in_specs=[
                pl.BlockSpec((block_b, K), lambda i: (i, 0)),        # xh (streamed per tile)
                pl.BlockSpec((block_b, Hp), lambda i: (i, 0)),       # h  (f32)
                pl.BlockSpec((K, 2 * Hp), lambda i: (0, 0)),         # w_rz (VMEM-resident)
                pl.BlockSpec((K, Hp), lambda i: (0, 0)),             # w_n  (VMEM-resident)
                pl.BlockSpec((1, 2 * Hp), lambda i: (0, 0)),         # b_rz
                pl.BlockSpec((1, Hp), lambda i: (0, 0)),             # b_n
            ],
            out_specs=pl.BlockSpec((block_b, Hp), lambda i: (i, 0)),
            scratch_shapes=[pltpu.VMEM((block_b, K), param_dtype)],  # [x | h*r] slab
        ),
        compiler_params=pltpu.CompilerParams(
            dimension_semantics=("parallel",),                       # megacore on v7x
        ),
    )(xh, hp, w_rz, w_n, b_rz, b_n)

    return out[:B, :H].astype(h.dtype)


def init_params(key, input_size, hidden_size, dtype=jnp.float32):
    """Match nn.Linear init U(-sqrt(k), sqrt(k)), k = 1/hidden_size.

    Weights are stored transposed vs nn.Linear, i.e. (in_features, out_features),
    so y = x @ W + b.  The r/z blocks keep the [r | z] column order of the module.
    """
    bound = math.sqrt(1.0 / hidden_size)
    keys = jax.random.split(key, 8)

    def u(kk, shape):
        return jax.random.uniform(kk, shape, dtype=dtype, minval=-bound, maxval=bound)

    return {
        "w_x_rz": u(keys[0], (input_size, 2 * hidden_size)),
        "b_x_rz": u(keys[1], (2 * hidden_size,)),
        "w_h_rz": u(keys[2], (hidden_size, 2 * hidden_size)),
        "b_h_rz": u(keys[3], (2 * hidden_size,)),
        "w_x_h": u(keys[4], (input_size, hidden_size)),
        "b_x_h": u(keys[5], (hidden_size,)),
        "w_h_h": u(keys[6], (hidden_size, hidden_size)),
        "b_h_h": u(keys[7], (hidden_size,)),
    }


def gru_cell_reference(x, h, p, param_dtype=jnp.bfloat16):
    """Pure-JAX reference of the PyTorch forward; param_dtype mirrors the kernel's
    bf16 matmul inputs (pass jnp.float32 for the full-precision reference)."""
    f32 = jnp.float32
    q = lambda a: a.astype(param_dtype).astype(f32)
    H = h.shape[-1]
    xq, hq = q(x), q(h)
    rz = (xq @ q(p["w_x_rz"]) + p["b_x_rz"]
          + hq @ q(p["w_h_rz"]) + p["b_h_rz"])
    r = jax.nn.sigmoid(rz[:, :H])
    z = jax.nn.sigmoid(rz[:, H:])
    cand = jnp.tanh(xq @ q(p["w_x_h"]) + p["b_x_h"]
                    + q(h * r) @ q(p["w_h_h"]) + p["b_h_h"])
    return z * h + (1.0 - z) * cand


if __name__ == "__main__":
    # Lane-dense sizes: hidden multiple of 128, batch tiled by 16 -> grid of 2
    # (exercises the "parallel" axis; input_size=64 exercises the padding path).
    batch, input_size, hidden_size = 32, 64, 128

    key = jax.random.PRNGKey(0)
    k_param, k_x, k_h = jax.random.split(key, 3)
    params = init_params(k_param, input_size, hidden_size)
    x = jax.random.normal(k_x, (batch, input_size), dtype=jnp.float32)
    h0 = jax.random.normal(k_h, (batch, hidden_size), dtype=jnp.float32)

    h1 = jax.block_until_ready(gru_cell_forward(x, h0, params, block_b=16))
    assert h1.shape == (batch, hidden_size)

    ref_bf16 = gru_cell_reference(x, h0, params)                       # matched precision
    ref_f32 = gru_cell_reference(x, h0, params, param_dtype=jnp.float32)
    assert jnp.allclose(h1, ref_bf16, atol=2e-3, rtol=2e-3), \
        float(jnp.max(jnp.abs(h1 - ref_bf16)))
    assert jnp.allclose(h1, ref_f32, atol=5e-2, rtol=5e-2)

    # Fully unaligned shapes go through the same wrapper (zero-padding path).
    b2, i2, hs2 = 10, 24, 40
    x2 = jax.random.normal(jax.random.PRNGKey(1), (b2, i2), dtype=jnp.float32)
    h2 = jax.random.normal(jax.random.PRNGKey(2), (b2, hs2), dtype=jnp.float32)
    p2 = init_params(jax.random.PRNGKey(3), i2, hs2)
    out2 = jax.block_until_ready(gru_cell_forward(x2, h2, p2))
    ref2 = gru_cell_reference(x2, h2, p2)
    assert out2.shape == (b2, hs2)
    assert jnp.allclose(out2, ref2, atol=2e-3, rtol=2e-3), \
        float(jnp.max(jnp.abs(out2 - ref2)))

    print("KERNEL_OK")
</pallas_src>

<mosaic_0001>
module attributes {stable_mosaic.version = 11 : i64} {
  func.func @gru_cell_kernel(%arg0: i32, %arg1: memref<16x256xbf16, #tpu.memory_space<vmem>>, %arg2: memref<16x128xf32, #tpu.memory_space<vmem>>, %arg3: memref<256x256xbf16, #tpu.memory_space<vmem>>, %arg4: memref<256x128xbf16, #tpu.memory_space<vmem>>, %arg5: memref<1x256xf32, #tpu.memory_space<vmem>>, %arg6: memref<1x128xf32, #tpu.memory_space<vmem>>, %arg7: memref<16x128xf32, #tpu.memory_space<vmem>>, %arg8: memref<16x256xbf16, #tpu.memory_space<vmem>>) attributes {dimension_semantics = [#tpu.dimension_semantics<parallel>], iteration_bounds = array<i64: 2>, scalar_prefetch = 0 : i64, scratch_operands = 1 : i64, tpu.core_type = #tpu.core_type<tc>, window_params = [{transform_indices = @transform_0, window_bounds = array<i64: 16, 256>}, {transform_indices = @transform_1, window_bounds = array<i64: 16, 128>}, {pipeline_mode = #tpu.pipeline_mode<synchronous>, transform_indices = @transform_2, window_bounds = array<i64: 256, 256>}, {pipeline_mode = #tpu.pipeline_mode<synchronous>, transform_indices = @transform_3, window_bounds = array<i64: 256, 128>}, {pipeline_mode = #tpu.pipeline_mode<synchronous>, transform_indices = @transform_4, window_bounds = array<i64: 1, 256>}, {pipeline_mode = #tpu.pipeline_mode<synchronous>, transform_indices = @transform_5, window_bounds = array<i64: 1, 128>}, {transform_indices = @transform_6, window_bounds = array<i64: 16, 128>}]} {
    %c0 = arith.constant 0 : index
    %c0_0 = arith.constant 0 : index
    %0 = vector.load %arg1[%c0, %c0_0] : memref<16x256xbf16, #tpu.memory_space<vmem>>, vector<16x256xbf16>
    %c0_1 = arith.constant 0 : index
    %c0_2 = arith.constant 0 : index
    %1 = vector.load %arg2[%c0_1, %c0_2] : memref<16x128xf32, #tpu.memory_space<vmem>>, vector<16x128xf32>
    %c0_3 = arith.constant 0 : index
    %c0_4 = arith.constant 0 : index
    %2 = vector.load %arg3[%c0_3, %c0_4] : memref<256x256xbf16, #tpu.memory_space<vmem>>, vector<256x256xbf16>
    %cst = arith.constant dense<0.000000e+00> : vector<16x256xf32>
    %3 = tpu.matmul %0, %2, %cst {dimension_numbers = #tpu.dot_dimension_numbers<[1], [0], [0], [1], [0, 0, 1, 1], [], []>} : vector<16x256xbf16>, vector<256x256xbf16>, vector<16x256xf32> -> vector<16x256xf32>
    %c0_5 = arith.constant 0 : index
    %c0_6 = arith.constant 0 : index
    %4 = vector.load %arg5[%c0_5, %c0_6] : memref<1x256xf32, #tpu.memory_space<vmem>>, vector<1x256xf32>
    %5 = vector.broadcast %4 : vector<1x256xf32> to vector<16x256xf32>
    %6 = arith.addf %3, %5 : vector<16x256xf32>
    %7 = vector.extract_strided_slice %6 {offsets = [0, 0], sizes = [16, 128], strides = [1, 1]} : vector<16x256xf32> to vector<16x128xf32>
    %8 = arith.negf %7 : vector<16x128xf32>
    %9 = math.exp %8 : vector<16x128xf32>
    %cst_7 = arith.constant 1.000000e+00 : f32
    %10 = vector.broadcast %cst_7 : f32 to vector<16x128xf32>
    %11 = arith.addf %10, %9 : vector<16x128xf32>
    %12 = arith.divf %10, %11 : vector<16x128xf32>
    %13 = vector.extract_strided_slice %6 {offsets = [0, 128], sizes = [16, 128], strides = [1, 1]} : vector<16x256xf32> to vector<16x128xf32>
    %14 = arith.negf %13 : vector<16x128xf32>
    %15 = math.exp %14 : vector<16x128xf32>
    %cst_8 = arith.constant 1.000000e+00 : f32
    %16 = vector.broadcast %cst_8 : f32 to vector<16x128xf32>
    %17 = arith.addf %16, %15 : vector<16x128xf32>
    %18 = arith.divf %16, %17 : vector<16x128xf32>
    %c0_9 = arith.constant 0 : index
    %c0_10 = arith.constant 0 : index
    %19 = vector.load %arg8[%c0_9, %c0_10] : memref<16x256xbf16, #tpu.memory_space<vmem>>, vector<16x256xbf16>
    tpu.vector_store %arg8[%c0_9, %c0_10], %0 {strides = array<i32>} : memref<16x256xbf16, #tpu.memory_space<vmem>>, vector<16x256xbf16>,
    %20 = arith.mulf %1, %12 : vector<16x128xf32>
    %21 = arith.truncf %20 : vector<16x128xf32> to vector<16x128xbf16>
    %c0_11 = arith.constant 0 : index
    %c128 = arith.constant 128 : index
    %22 = vector.load %arg8[%c0_11, %c128] : memref<16x256xbf16, #tpu.memory_space<vmem>>, vector<16x128xbf16>
    tpu.vector_store %arg8[%c0_11, %c128], %21 {strides = array<i32>} : memref<16x256xbf16, #tpu.memory_space<vmem>>, vector<16x128xbf16>,
    %c0_12 = arith.constant 0 : index
    %c0_13 = arith.constant 0 : index
    %23 = vector.load %arg8[%c0_12, %c0_13] : memref<16x256xbf16, #tpu.memory_space<vmem>>, vector<16x256xbf16>
    %c0_14 = arith.constant 0 : index
    %c0_15 = arith.constant 0 : index
    %24 = vector.load %arg4[%c0_14, %c0_15] : memref<256x128xbf16, #tpu.memory_space<vmem>>, vector<256x128xbf16>
    %cst_16 = arith.constant dense<0.000000e+00> : vector<16x128xf32>
    %25 = tpu.matmul %23, %24, %cst_16 {dimension_numbers = #tpu.dot_dimension_numbers<[1], [0], [0], [1], [0, 0, 1, 1], [], []>} : vector<16x256xbf16>, vector<256x128xbf16>, vector<16x128xf32> -> vector<16x128xf32>
    %c0_17 = arith.constant 0 : index
    %c0_18 = arith.constant 0 : index
    %26 = vector.load %arg6[%c0_17, %c0_18] : memref<1x128xf32, #tpu.memory_space<vmem>>, vector<1x128xf32>
    %27 = vector.broadcast %26 : vector<1x128xf32> to vector<16x128xf32>
    %28 = arith.addf %25, %27 : vector<16x128xf32>
    %29 = math.tanh %28 : vector<16x128xf32>
    %30 = arith.subf %1, %29 : vector<16x128xf32>
    %31 = arith.mulf %18, %30 : vector<16x128xf32>
    %32 = arith.addf %29, %31 : vector<16x128xf32>
    %c0_19 = arith.constant 0 : index
    %c0_20 = arith.constant 0 : index
    %33 = vector.load %arg7[%c0_19, %c0_20] : memref<16x128xf32, #tpu.memory_space<vmem>>, vector<16x128xf32>
    tpu.vector_store %arg7[%c0_19, %c0_20], %32 {strides = array<i32>} : memref<16x128xf32, #tpu.memory_space<vmem>>, vector<16x128xf32>,
    return
  }
  func.func @transform_0(%arg0: i32) -> (i32, i32) {
    %c0_i32 = arith.constant 0 : i32
    %c0_i32_0 = arith.constant 0 : i32
    return %arg0, %c0_i32 : i32, i32
  }
  func.func @transform_1(%arg0: i32) -> (i32, i32) {
    %c0_i32 = arith.constant 0 : i32
    %c0_i32_0 = arith.constant 0 : i32
    return %arg0, %c0_i32 : i32, i32
  }
  func.func @transform_2(%arg0: i32) -> (i32, i32) {
    %c0_i32 = arith.constant 0 : i32
    %c0_i32_0 = arith.constant 0 : i32
    %c0_i32_1 = arith.constant 0 : i32
    return %c0_i32, %c0_i32_0 : i32, i32
  }
  func.func @transform_3(%arg0: i32) -> (i32, i32) {
    %c0_i32 = arith.constant 0 : i32
    %c0_i32_0 = arith.constant 0 : i32
    %c0_i32_1 = arith.constant 0 : i32
    return %c0_i32, %c0_i32_0 : i32, i32
  }
  func.func @transform_4(%arg0: i32) -> (i32, i32) {
    %c0_i32 = arith.constant 0 : i32
    %c0_i32_0 = arith.constant 0 : i32
    %c0_i32_1 = arith.constant 0 : i32
    return %c0_i32, %c0_i32_0 : i32, i32
  }
  func.func @transform_5(%arg0: i32) -> (i32, i32) {
    %c0_i32 = arith.constant 0 : i32
    %c0_i32_0 = arith.constant 0 : i32
    %c0_i32_1 = arith.constant 0 : i32
    return %c0_i32, %c0_i32_0 : i32, i32
  }
  func.func @transform_6(%arg0: i32) -> (i32, i32) {
    %c0_i32 = arith.constant 0 : i32
    %c0_i32_0 = arith.constant 0 : i32
    return %arg0, %c0_i32 : i32, i32
  }
}

</mosaic_0001>

<bundles_post_ra>
// kernel: tpu_custom_call.1
= control target key start
LH: loop header
LB: loop body
LE: loop exit
PB: predicated region body
PF: predicated region fallthrough
CT: control target
= control target key end

     0   :  { %s1865_s0 = inlined_call_operand.hbm [shape: bf16[32,256], index: 0, kind: input, shape index: {}]   ;;  %s1866_s1 = inlined_call_operand.hbm [shape: f32[32,128], index: 1, kind: input, shape index: {}]   ;;  %s1867_s2 = inlined_call_operand.hbm [shape: bf16[256,256], index: 2, kind: input, shape index: {}]   ;;  %s1868_s3 = inlined_call_operand.hbm [shape: bf16[256,128], index: 3, kind: input, shape index: {}]   ;;  %s1869_s4 = inlined_call_operand.vmem [shape: f32[1,256], index: 4, kind: input, shape index: {}]   ;;  %s1870_s5 = inlined_call_operand.vmem [shape: f32[1,128], index: 5, kind: input, shape index: {}]   ;;  %s1871_s6 = inlined_call_operand.hbm [shape: f32[32,128], index: 6, kind: output, shape index: {}]  }
   0x1   :  { %1877 = sst [smem:[#allocation19_spill]] %s1865_s0 }
   0x2   :  { %1878 = sst [smem:[#allocation20_spill]] %s1867_s2 }
   0x3   :  { %1879 = sst [smem:[#allocation21_spill]] %s1868_s3 }
   0x4   :  { %11 = vsyncpa [#allocation4], 0 }
   0x5   :  { %13 = vsyncpa [#allocation4 + $0x1], 0 }
   0x6   :  { %14 = vsyncpa [#allocation7], 0 }
   0x7   :  { %16 = vsyncpa [#allocation7 + $0x1], 0 }
   0x8   :  { %17 = vsyncpa [#allocation10], 0 }
   0x9   :  { %18 = vsyncpa [#allocation5], 0 }
   0xa   :  { %20 = vsyncpa [#allocation5 + $0x1], 0  ;;  %s1649_s21 = smov 0   ;;  %s1651_s22 = smov 0  }
   0xb   :  { %s1653_s23 = smov 0   ;;  %s1655_s24 = smov 0  }
   0xc LB: > { %1880 = sst [smem:[#allocation17_spill]] %s1600_s23  ;;  %s1670_s25 = sadd.s32 4294967295, %s1604_s24   ;;  %s1604_s24 = sphi %s1655_s24, %s1897_s24   ;;  %s1600_s23 = sphi %s1653_s23, %s1894_s23   ;;  %s1596_s22 = sphi %s1651_s22, %s1896_s22   ;;  %s1592_s21 = sphi %s1649_s21, %s1895_s21  }
   0xd   : > { %s1016_s26 = sadd.s32 4294967294, %s1604_s24   ;;  %p46_p0 = scmp.ne.s32.totalorder %s1596_s22, %s1592_s21 }
   0xe   : > { %p47_p1 = scmp.eq.s32.totalorder %s1670_s25, 0  ;;  %p180_p2 = scmp.eq.s32.totalorder %s1670_s25, 1 }
   0xf   : > { %p186_p3 = scmp.eq.s32.totalorder %s1016_s26, 1  ;;  %p1017_p5 = scmp.ge.s32.totalorder %s1604_s24, 1 }
  0x10   : > { %p1679_p4 = por %p47_p1, %p46_p0  ;;  %p193_p7 = scmp.lt.s32.totalorder %s1604_s24, 3 }
  0x11   : > { %p1684_p6 = por %p186_p3, %p46_p0  ;;  %s1883_s2 = sld [smem:[#allocation20_spill]] }
  0x12   : > { %p1692_p8 = pnand %p1017_p5, %p193_p7  ;;  %s1606_s9 = smov [#allocation8]  }
  0x13   : > { %s206_s10 = sshll.u32 %s1606_s9, 4  ;;  %s1885_s3 = sld [smem:[#allocation21_spill]]  ;;  %s207_s10 = int_to_ptr.vmem [resolvable:$true] %s206_s10 }
  0x14   : > { %p1321_p9 = pneg %p1692_p8  ;;  %s1872_s14 = smov 128  }
  0x15   : > { %s1874_s15 = smov 8   ;;  %s1609_s16 = smov [#allocation9]  }
  0x16   : > { %p1322_p10 = pnand %p1321_p9, %p47_p1  ;;  %s220_s17 = sshll.u32 %s1609_s16, 4  ;;  %s221_s17 = int_to_ptr.vmem [resolvable:$true] %s220_s17 }
  0x17   : > { %s204_s7 = sshll.u32 %s1883_s2, 4  ;;  %s1610_s18 = smov 64   ;;  %s205_s7 = int_to_ptr.hbm [resolvable:$true] %s204_s7 }
  0x18   : > { %1324 = dma.hbm_to_vmem [thread:$0]  (!%p1322_p10), %s205_s7, 4096, %s207_s10, [#allocation7], %s1872_s14, %s1872_s14, %s1874_s15  }
  0x19   : > { %s218_s13 = sshll.u32 %s1885_s3, 4  ;;  %s1611_s19 = smov 4   ;;  %s219_s13 = int_to_ptr.hbm [resolvable:$true] %s218_s13 }
  0x1a   : > { %1327 = dma.hbm_to_vmem [thread:$0]  (!%p1322_p10), %s219_s13, 2048, %s221_s17, [#allocation10], %s1610_s18, %s1610_s18, %s1611_s19  }
  0x1b   : > { %s1708_s20 = sadd.s32 1, %s1604_s24   ;;  %s33_s29 = sadd.s32 1, %s1600_s23 }
  0x1c   : > { %s30_s26 = ssub.s32 %s1604_s24, %s1708_s20  ;;  %p40_p13 = scmp.ne.s32.totalorder %s1600_s23, %s1596_s22 }
  0x1d   : > { %p31_p12 = scmp.eq.s32.totalorder %s30_s26, 0  ;;  %p41_p0 = scmp.eq.s32.totalorder %s1604_s24, 0 }
  0x1e   : > { %p1721_p5 = por %p180_p2, %p40_p13  ;;  %p1341_p7 = scmp.lt.s32.totalorder %s1604_s24, 2 }
  0x1f   : > { %s1717_s30 = scalar_select %p31_p12, %s1600_s23, %s33_s29  }
  0x20   : > { %p42_p3 = por %p41_p0, %p40_p13  ;;  %s240_s9 = sand.u32 1, %s1600_s23  }
  0x21   : > { %1886 = sst [smem:[#allocation18_spill]] %s1717_s30  ;;  %s1727_s10 = sshll.u32 %s240_s9, 4 }
  0x22   : > { %s1252_s11 = sshll.u32 %s1604_s24, 4  ;;  %s1888_s0 = sld [smem:[#allocation19_spill]] }
  0x23   : > { %s244_s17 = scalar_lea.vmem [#allocation3], %s1727_s10  ;;  %p1734_p9 = pnand %p1341_p7, %p42_p3 }
  0x24   : > { %s253_s18 = sshll.u32 %s244_s17, 4  ;;  %s272_s15 = scalar_lea.hbm %s1866_s1, %s1252_s11  ;;  %s254_s18 = int_to_ptr.vmem [resolvable:$true] %s253_s18 }
  0x25   : > { %s273_s2 = sshll.u32 %s272_s15, 4  ;;  %s241_s3 = scalar_lea.sflag [#allocation4], %s240_s9  ;;  %s274_s2 = int_to_ptr.hbm [resolvable:$true] %s273_s2 }
  0x26   : > { %p1470_p10 = pneg %p1734_p9 }
  0x28   : > { %s250_s16 = scalar_lea.hbm %s1888_s0, %s1252_s11  ;;  %s1473_s17 = scalar_lea.hbm %s1888_s0, 32 }
  0x29   : > { %s251_s19 = sshll.u32 %s250_s16, 4  ;;  %s252_s19 = int_to_ptr.hbm [resolvable:$true] %s251_s19 }
  0x2a   : > { %s1466_s30 = sshra.s32 %s252_s19, 4  ;;  %s1467_s30 = int_to_ptr.hbm [resolvable:$true] %s1466_s30 }
  0x2b   : > { %s1468_s12 = scalar_lea.hbm %s1467_s30, 16  ;;  %p1474_p0 = scmp.lt.s32.totalorder %s1467_s30, %s1888_s0 }
  0x2c   : > { %p1469_p2 = scmp.ne.s32.totalorder %s1467_s30, %s1468_s12  ;;  %p1475_p3 = scmp.lt.s32.totalorder %s1473_s17, %s1468_s12 }
  0x2e   : > { %p1471_p12 = pnand %p1470_p10, %p1469_p2  ;;  %p1476_p7 = por %p1475_p3, %p1474_p0 }
  0x30   : > { %p1472_p13 = pneg %p1471_p12 }
  0x32   : > { %p1477_p11 = pnand %p1476_p7, %p1472_p13 }
  0x34   : > { %1480 = shalt.err (!%p1477_p11)
}
  0x35   : > { %s1890_s15 = smov 8   ;;  %s1891_s9 = smov 128  }
  0x36   : > { %1331 = dma.hbm_to_vmem [thread:$0]  (!%p1734_p9), %s252_s19, 256, %s254_s18, %s241_s3, %s1891_s9, %s1891_s9, %s1890_s15  }
  0x37   : > { %s267_s11 = scalar_lea.vmem [#allocation6], %s1727_s10  ;;  %s263_s16 = sand.u32 1, %s1604_s24  }
  0x38   : > { %s275_s13 = sshll.u32 %s267_s11, 4  ;;  %s264_s14 = scalar_lea.sflag [#allocation7], %s263_s16  ;;  %s276_s13 = int_to_ptr.vmem [resolvable:$true] %s275_s13 }
  0x39   : > { %s1496_s30 = sshra.s32 %s274_s2, 4  ;;  %s1503_s0 = scalar_lea.hbm %s1866_s1, 32  ;;  %s1497_s30 = int_to_ptr.hbm [resolvable:$true] %s1496_s30 }
  0x3a   : > { %s1498_s12 = scalar_lea.hbm %s1497_s30, 16  ;;  %p1504_p13 = scmp.lt.s32.totalorder %s1497_s30, %s1866_s1 }
  0x3b   : > { %p1499_p2 = scmp.ne.s32.totalorder %s1497_s30, %s1498_s12  ;;  %p1505_p0 = scmp.lt.s32.totalorder %s1503_s0, %s1498_s12 }
  0x3d   : > { %p1501_p11 = pnand %p1499_p2, %p1470_p10  ;;  %p1506_p3 = por %p1505_p0, %p1504_p13 }
  0x3f   : > { %p1502_p12 = pneg %p1501_p11 }
  0x41   : > { %p1507_p7 = pnand %p1506_p3, %p1502_p12 }
  0x43   : > { %1510 = shalt.err (!%p1507_p7)
}
  0x44   : > { %1334 = dma.hbm_to_vmem [thread:$0]  (!%p1734_p9), %s274_s2, 256, %s276_s13, %s264_s14, %s1891_s9, %s1891_s9, %s1890_s15  }
  0x45   : > { %287 = sbr.rel (%p1692_p8) target bundleno = 449 (0x1c1), region = 44  ;;  %s1776_s10 = sand.u32 (!%p1692_p8), 1, %s1596_s22  }
  0x46   : > { %s1779_s23 = sshll.u32 (!%p1692_p8), %s1776_s10, 4  ;;  %s290_s0 = scalar_lea.sflag (!%p1692_p8), [#allocation4], %s1776_s10 }
  0x47   : > { %s1783_s18 = scalar_lea.vmem (!%p1692_p8), [#allocation3], %s1779_s23 }
  0x4a   : > { %1571 = dma.done.wait (%p1679_p4), %s290_s0, 256  }
  0x4b   : > { %1573 = vsyncadd (%p1679_p4), %s290_s0, 4294967040  ;;  %s299_s2 = sand.u32 1, %s1670_s25   ;;  %s303_s19 = scalar_lea.vmem [#allocation6], %s1779_s23 }
  0x4c   : > { %s300_s8 = scalar_lea.sflag [#allocation7], %s299_s2 }
  0x4d   : > { %1575 = dma.done.wait (%p1679_p4), %s300_s8, 256  }
  0x4e   : > { %1577 = vsyncadd (%p1679_p4), %s300_s8, 4294967040 }
  0x4f   : > { %1579 = dma.done.wait (%p47_p1), [#allocation7], 4096  }
  0x50   : > { %1581 = vsyncadd (%p47_p1), [#allocation7], 4294963200 }
  0x51   : > { %1583 = dma.done.wait (%p47_p1), [#allocation10], 2048  }
  0x52   : > { %1585 = vsyncadd (%p47_p1), [#allocation10], 4294965248  ;;  %v1100_v0 = vld [vmem:[#allocation8 + $0x70] sm:$0xf]  ;;  %v1271_v1 = vld [vmem:[#allocation8 + $0x74] sm:$0xf0] }
  0x53   : > { %v1164_v2 = vld [vmem:[#allocation8 + $0xf0] sm:$0xf]  ;;  %v1101_v3 = vor.u32 %v1271_v1, %v1100_v0  ;;  %v1287_v4 = vld [vmem:[#allocation8 + $0xf4] sm:$0xf0]  ;;  %v1092_v5 = vld [vmem:[#allocation8 + $0x60] sm:$0xf] }
  0x54   : > { %v1269_v6 = vld [vmem:[#allocation8 + $0x64] sm:$0xf0]  ;;  %v1165_v7 = vor.u32 %v1287_v4, %v1164_v2  ;;  %v1156_v8 = vld [vmem:[#allocation8 + $0xe0] sm:$0xf]  ;;  %v1084_v12 = vld [vmem:[#allocation8 + $0x50] sm:$0xf] }
  0x55   : > { %v1285_v9 = vld [vmem:[#allocation8 + $0xe4] sm:$0xf0]  ;;  %563 = vmatpush.bf16.msra.mxu0 %v1101_v3  ;;  %v1093_v10 = vor.u32 %v1269_v6, %v1092_v5  ;;  %v1267_v13 = vld [vmem:[#allocation8 + $0x54] sm:$0xf0]  ;;  %v1148_v14 = vld [vmem:[#allocation8 + $0xd0] sm:$0xf] }
  0x56   : > { %577 = vmatpush.bf16.msra.mxu1 %v1165_v7  ;;  %v1157_v11 = vor.u32 %v1285_v9, %v1156_v8  ;;  %v1283_v15 = vld [vmem:[#allocation8 + $0xd4] sm:$0xf0]  ;;  %v1085_v16 = vor.u32 %v1267_v13, %v1084_v12  ;;  %v1076_v18 = vld [vmem:[#allocation8 + $0x40] sm:$0xf]  ;;  %v1265_v19 = vld [vmem:[#allocation8 + $0x44] sm:$0xf0] }
  0x57   : > { %v1149_v17 = vor.u32 %v1283_v15, %v1148_v14  ;;  %v1140_v20 = vld [vmem:[#allocation8 + $0xc0] sm:$0xf]  ;;  %v1281_v21 = vld [vmem:[#allocation8 + $0xc4] sm:$0xf0]  ;;  %v1068_v22 = vld [vmem:[#allocation8 + $0x30] sm:$0xf]  ;;  %v1077_v23 = vor.u32 %v1265_v19, %v1076_v18 }
  0x58   : > { %v1263_v24 = vld [vmem:[#allocation8 + $0x34] sm:$0xf0]  ;;  %v1132_v25 = vld [vmem:[#allocation8 + $0xb0] sm:$0xf]  ;;  %v1141_v27 = vor.u32 %v1281_v21, %v1140_v20  ;;  %v1270_v28 = vld [vmem:[#allocation8 + $0x74] sm:$0xf] }
  0x59   : > { %564 = vmatpush.bf16.msra.mxu0 %v1093_v10  ;;  %v1279_v26 = vld [vmem:[#allocation8 + $0xb4] sm:$0xf0]  ;;  %v1102_v29 = vld [vmem:[#allocation8 + $0x78] sm:$0xf0]  ;;  %v1286_v30 = vld [vmem:[#allocation8 + $0xf4] sm:$0xf]  ;;  %v1069_v38 = vor.u32 %v1263_v24, %v1068_v22 }
  0x5a   : > { %578 = vmatpush.bf16.msra.mxu1 %v1157_v11  ;;  %v1105_v31 = vor.u32 %v1270_v28, %v1102_v29  ;;  %v1166_v32 = vld [vmem:[#allocation8 + $0xf8] sm:$0xf0]  ;;  %v1268_v33 = vld [vmem:[#allocation8 + $0x64] sm:$0xf]  ;;  %v1094_v34 = vld [vmem:[#allocation8 + $0x68] sm:$0xf0]  ;;  %v1133_v42 = vor.u32 %v1279_v26, %v1132_v25 }
  0x5b   : > { %v1169_v35 = vor.u32 %v1286_v30, %v1166_v32  ;;  %v1284_v36 = vld [vmem:[#allocation8 + $0xe4] sm:$0xf]  ;;  %v1158_v37 = vld [vmem:[#allocation8 + $0xe8] sm:$0xf0]  ;;  %v1060_v39 = vld [vmem:[#allocation8 + $0x20] sm:$0xf]  ;;  %v1097_v41 = vor.u32 %v1268_v33, %v1094_v34 }
  0x5c   : > { %v1261_v40 = vld [vmem:[#allocation8 + $0x24] sm:$0xf0]  ;;  %591 = vmatpush.bf16.msra.mxu2 %v1105_v31  ;;  %v1124_v43 = vld [vmem:[#allocation8 + $0xa0] sm:$0xf]  ;;  %v1161_v44 = vor.u32 %v1284_v36, %v1158_v37  ;;  %v1266_v45 = vld [vmem:[#allocation8 + $0x54] sm:$0xf] }
  0x5d   : > { %565 = vmatpush.bf16.msra.mxu0 %v1085_v16  ;;  %605 = vmatpush.bf16.msra.mxu3 %v1169_v35  ;;  %v1086_v46 = vld [vmem:[#allocation8 + $0x58] sm:$0xf0]  ;;  %v1277_v47 = vld [vmem:[#allocation8 + $0xa4] sm:$0xf0]  ;;  %v1282_v48 = vld [vmem:[#allocation8 + $0xd4] sm:$0xf]  ;;  %v1061_v50 = vor.u32 %v1261_v40, %v1060_v39 }
  0x5e   : > { %579 = vmatpush.bf16.msra.mxu1 %v1149_v17  ;;  %v1150_v49 = vld [vmem:[#allocation8 + $0xd8] sm:$0xf0]  ;;  %v1052_v51 = vld [vmem:[#allocation8 + $0x10] sm:$0xf]  ;;  %v1259_v52 = vld [vmem:[#allocation8 + $0x14] sm:$0xf0]  ;;  %v1089_v54 = vor.u32 %v1266_v45, %v1086_v46  ;;  %v1125_v55 = vor.u32 %v1277_v47, %v1124_v43 }
  0x5f   : > { %v1116_v53 = vld [vmem:[#allocation8 + $0x90] sm:$0xf]  ;;  %v1153_v56 = vor.u32 %v1282_v48, %v1150_v49  ;;  %v1264_v57 = vld [vmem:[#allocation8 + $0x44] sm:$0xf]  ;;  %v1078_v58 = vld [vmem:[#allocation8 + $0x48] sm:$0xf0]  ;;  %v1053_v62 = vor.u32 %v1259_v52, %v1052_v51 }
  0x60   : > { %592 = vmatpush.bf16.msra.mxu2 %v1097_v41  ;;  %v1275_v59 = vld [vmem:[#allocation8 + $0x94] sm:$0xf0]  ;;  %v1280_v60 = vld [vmem:[#allocation8 + $0xc4] sm:$0xf]  ;;  %v1142_v61 = vld [vmem:[#allocation8 + $0xc8] sm:$0xf0]  ;;  %v1081_v1 = vor.u32 %v1264_v57, %v1078_v58 }
  0x61   : > { %566 = vmatpush.bf16.msra.mxu0 %v1077_v23  ;;  %606 = vmatpush.bf16.msra.mxu3 %v1161_v44  ;;  %v1044_v63 = vld [vmem:[#allocation8] sm:$0xf]  ;;  %v1257_v0 = vld [vmem:[#allocation8 + $0x4] sm:$0xf0]  ;;  %v1117_v2 = vor.u32 %v1275_v59, %v1116_v53  ;;  %v1145_v4 = vor.u32 %v1280_v60, %v1142_v61  ;;  %v1262_v5 = vld [vmem:[#allocation8 + $0x34] sm:$0xf] }
  0x62   : > { %580 = vmatpush.bf16.msra.mxu1 %v1141_v27  ;;  %v1108_v3 = vld [vmem:[#allocation8 + $0x80] sm:$0xf]  ;;  %v1070_v6 = vld [vmem:[#allocation8 + $0x38] sm:$0xf0]  ;;  %v1273_v7 = vld [vmem:[#allocation8 + $0x84] sm:$0xf0]  ;;  %v1045_v10 = vor.u32 %v1257_v0, %v1044_v63 }
  0x63   : > { %v1278_v8 = vld [vmem:[#allocation8 + $0xb4] sm:$0xf]  ;;  %v1134_v9 = vld [vmem:[#allocation8 + $0xb8] sm:$0xf0]  ;;  %v1036_v11 = vld [vmem:[%s1783_s18] sm:$0xf]  ;;  %v1073_v14 = vor.u32 %v1262_v5, %v1070_v6  ;;  %v1109_v15 = vor.u32 %v1273_v7, %v1108_v3 }
  0x64   : > { %593 = vmatpush.bf16.msra.mxu2 %v1089_v54  ;;  %v1255_v12 = vld [vmem:[%s1783_s18 + $0x4] sm:$0xf0]  ;;  %v1254_v13 = vld [vmem:[%s1783_s18 + $0x4] sm:$0xf]  ;;  %v1038_v16 = vld [vmem:[%s1783_s18 + $0x8] sm:$0xf0]  ;;  %v1137_v17 = vor.u32 %v1278_v8, %v1134_v9 }
  0x65   : > { %567 = vmatpush.bf16.msra.mxu0 %v1069_v38  ;;  %607 = vmatpush.bf16.msra.mxu3 %v1153_v56  ;;  %v1260_v18 = vld [vmem:[#allocation8 + $0x24] sm:$0xf]  ;;  %v1062_v19 = vld [vmem:[#allocation8 + $0x28] sm:$0xf0]  ;;  %v1037_v22 = vor.u32 %v1255_v12, %v1036_v11  ;;  %v1041_v23 = vor.u32 %v1254_v13, %v1038_v16  ;;  %v1258_v26 = vld [vmem:[#allocation8 + $0x14] sm:$0xf] }
  0x66   : > { %581 = vmatpush.bf16.msra.mxu1 %v1133_v42  ;;  %v1276_v20 = vld [vmem:[#allocation8 + $0xa4] sm:$0xf]  ;;  %v1126_v21 = vld [vmem:[#allocation8 + $0xa8] sm:$0xf0]  ;;  %v1065_v24 = vor.u32 %v1260_v18, %v1062_v19  ;;  %v1054_v27 = vld [vmem:[#allocation8 + $0x18] sm:$0xf0] }
  0x67   : > { %v1129_v25 = vor.u32 %v1276_v20, %v1126_v21  ;;  %v1057_v28 = vor.u32 %v1258_v26, %v1054_v27  ;;  %v1274_v29 = vld [vmem:[#allocation8 + $0x94] sm:$0xf]  ;;  %v1118_v30 = vld [vmem:[#allocation8 + $0x98] sm:$0xf0]  ;;  %v1256_v33 = vld [vmem:[#allocation8 + $0x4] sm:$0xf] }
  0x68   : > { %594 = vmatpush.bf16.msra.mxu2 %v1081_v1  ;;  %v351_v31 = vld [vmem:[%s1783_s18] sm:$0xff]  ;;  %v1121_v32 = vor.u32 %v1274_v29, %v1118_v30  ;;  %v1046_v34 = vld [vmem:[#allocation8 + $0x8] sm:$0xf0]  ;;  %v1297_v39 = vld [vmem:[#allocation9 + $0x38] sm:$0xff]  ;;  %s1306_s11 = sshll.u32 %s1670_s25, 4  ;;  %s347_s30 = scalar_lea.vmem [#allocation11], %s1779_s23 }
  0x69   : > { %568 = vmatpush.bf16.msra.mxu0 %v1061_v50  ;;  %608 = vmatpush.bf16.msra.mxu3 %v1145_v4  ;;  %695 = vst [vmem:[#allocation2] sm:$0xff] %v351_v31  ;;  %v1049_v35 = vor.u32 %v1256_v33, %v1046_v34  ;;  %v1272_v36 = vld [vmem:[#allocation8 + $0x84] sm:$0xf]  ;;  %v1110_v37 = vld [vmem:[#allocation8 + $0x88] sm:$0xf0]  ;;  %v1296_v40 = vld [vmem:[#allocation9 + $0x30] sm:$0xff]  ;;  %s897_s14 = scalar_lea.hbm %s1871_s6, %s1306_s11 }
  0x6a   : > { %582 = vmatpush.bf16.msra.mxu1 %v1125_v55  ;;  %v1113_v38 = vor.u32 %v1272_v36, %v1110_v37  ;;  %v1295_v41 = vld [vmem:[#allocation9 + $0x28] sm:$0xff]  ;;  %v1305_v42 = vld [vmem:[#allocation9 + $0x78] sm:$0xff]  ;;  %v1294_v43 = vld [vmem:[#allocation9 + $0x20] sm:$0xff]  ;;  %s898_s12 = sshll.u32 %s347_s30, 4  ;;  %s900_s17 = sshll.u32 %s897_s14, 4  ;;  %s899_s12 = int_to_ptr.vmem [resolvable:$true] %s898_s12  ;;  %s901_s17 = int_to_ptr.hbm [resolvable:$true] %s900_s17 }
  0x6b   : > { %v1811_v44 = vld [vmem:[%s1869_s4] sm:$0x3]  ;;  %v1293_v47 = vld [vmem:[#allocation9 + $0x18] sm:$0xff]  ;;  %v1303_v48 = vld [vmem:[#allocation9 + $0x68] sm:$0xff]  ;;  %s886_s25 = scalar_lea.sflag [#allocation5], %s1776_s10  ;;  %s1540_s29 = sshra.s32 %s901_s17, 4  ;;  %s1541_s29 = int_to_ptr.hbm [resolvable:$true] %s1540_s29 }
  0x6c   : > { %595 = vmatpush.bf16.msra.mxu2 %v1073_v14  ;;  %v1304_v45 = vld [vmem:[#allocation9 + $0x70] sm:$0xff]  ;;  %v389_v46 = vperm.slane %v1811_v44, 0  ;;  %v352_v54 = vld [vmem:[%s1783_s18 + $0x8] sm:$0xff]  ;;  %v1302_v55 = vld [vmem:[#allocation9 + $0x60] sm:$0xff]  ;;  %s1542_s3 = scalar_lea.hbm %s1541_s29, 16  ;;  %s1546_s18 = scalar_lea.hbm %s1871_s6, 32 }
  0x6d   : > { %569 = vmatpush.bf16.msra.mxu0 %v1053_v62  ;;  %609 = vmatpush.bf16.msra.mxu3 %v1137_v17  ;;  %v1292_v52 = vld [vmem:[#allocation9 + $0x10] sm:$0xff]  ;;  %696 = vst [vmem:[#allocation2 + $0x8] sm:$0xff] %v352_v54  ;;  %v1291_v57 = vld [vmem:[#allocation9 + $0x8] sm:$0xff]  ;;  %v1301_v58 = vld [vmem:[#allocation9 + $0x58] sm:$0xff]  ;;  %p1543_p1 = scmp.ne.s32.totalorder %s1541_s29, %s1542_s3  ;;  %p1547_p9 = scmp.lt.s32.totalorder %s1541_s29, %s1871_s6 }
  0x6e   : > { %583 = vmatpush.bf16.msra.mxu1 %v1117_v2  ;;  %v1290_v61 = vld [vmem:[#allocation9] sm:$0xff]  ;;  %v1300_v0 = vld [vmem:[#allocation9 + $0x50] sm:$0xff]  ;;  %v1299_v6 = vld [vmem:[#allocation9 + $0x48] sm:$0xff]  ;;  %p1548_p10 = scmp.lt.s32.totalorder %s1546_s18, %s1542_s3 }
  0x6f   : > { %v1298_v8 = vld [vmem:[#allocation9 + $0x40] sm:$0xff]  ;;  %v1822_v31 = vld [vmem:[%s303_s19 + $0x8] sm:$0xff]  ;;  %p1544_p4 = pnand %p1543_p1, %p1721_p5 }
  0x70   : > { %596 = vmatpush.bf16.msra.mxu2 %v1065_v24  ;;  %v1176_v1 = vld [vmem:[#allocation2] sm:$0xf]  ;;  %p1549_p2 = por %p1548_p10, %p1547_p9 }
  0x71   : > { %570 = vmatpush.bf16.msra.mxu0 %v1045_v10  ;;  %610 = vmatpush.bf16.msra.mxu3 %v1129_v25  ;;  %v1817_v19 = vld [vmem:[%s303_s19] sm:$0xff]  ;;  %p1545_p8 = pneg %p1544_p4 }
  0x72   : > { %584 = vmatpush.bf16.msra.mxu1 %v1109_v15 }
  0x73   : > { %p1550_p11 = pnand %p1549_p2, %p1545_p8 }
  0x74   : > { %571 = vmatmul.bf16.vlgmr.msra.gmra.mxu0 %v1037_v22  ;;  %597 = vmatpush.bf16.msra.mxu2 %v1057_v28  ;;  %v1289_v2 = vld [vmem:[#allocation2 + $0x4] sm:$0xf0] }
  0x75   : > { %585 = vmatmul.bf16.vlgmr.msra.gmra.mxu1 %v1041_v23  ;;  %611 = vmatpush.bf16.msra.mxu3 %v1121_v32  ;;  %v1177_v3 = vor.u32 %v1289_v2, %v1176_v1 }
  0x76   : > { %847 = vmatpush.bf16.msrb.mxu0 %v1297_v39  ;;  %861 = vmatpush.bf16.msrb.mxu1 %v1305_v42 }
  0x78   : > { %598 = vmatpush.bf16.msra.mxu2 %v1049_v35 }
  0x79   : > { %612 = vmatpush.bf16.msra.mxu3 %v1113_v38 }
  0x7a   : > { %848 = vmatpush.bf16.msrb.mxu0 %v1296_v40  ;;  %862 = vmatpush.bf16.msrb.mxu1 %v1304_v45 }
  0x7b   : > { %599 = vmatmul.bf16.vlgmr.msra.gmra.mxu2 %v1037_v22 }
  0x7c   : > { %613 = vmatmul.bf16.vlgmr.msra.gmra.mxu3 %v1041_v23 }
  0x7e   : > { %849 = vmatpush.bf16.msrb.mxu0 %v1295_v41  ;;  %863 = vmatpush.bf16.msrb.mxu1 %v1303_v48  ;;  %v390_v41 = vperm.slane %v1811_v44, 1  ;;  %v1385_v44 = vld [vmem:[%s1870_s5] ss:$0 sm:$0xff] }
  0x82   : > { %850 = vmatpush.bf16.msrb.mxu0 %v1294_v43  ;;  %864 = vmatpush.bf16.msrb.mxu1 %v1302_v55 }
  0x86   : > { %851 = vmatpush.bf16.msrb.mxu0 %v1293_v47  ;;  %865 = vmatpush.bf16.msrb.mxu1 %v1301_v58 }
  0x8a   : > { %852 = vmatpush.bf16.msrb.mxu0 %v1292_v52  ;;  %866 = vmatpush.bf16.msrb.mxu1 %v1300_v0 }
  0x8e   : > { %853 = vmatpush.bf16.msrb.mxu0 %v1291_v57  ;;  %867 = vmatpush.bf16.msrb.mxu1 %v1299_v6 }
  0x92   : > { %854 = vmatpush.bf16.msrb.mxu0 %v1290_v61  ;;  %868 = vmatpush.bf16.msrb.mxu1 %v1298_v8 }
  0x95   : > { %855 = vmatmul.bf16.vlgmr.msrb.gmra.mxu0 %v1177_v3 }
  0xf1   : > { %v572_v49 = vpop.f32.mrf.mxu0 }
  0xf2   : > { %v573_v50 = vadd.f32 %v572_v49, %v389_v46  ;;  %v586_v51 = vpop.f32.mrf.mxu1 }
  0xf4   : > { %v587_v53 = vadd.f32 %v586_v51, %v573_v50 }
  0xf6   : > { %v1170_v56 = vmul.f32 -1.442695, %v587_v53 }
  0xf8   : > { %1386 = vpow2.f32 %v1170_v56 }
  0xf9   : > { %v574_v59 = vpop.f32.mrf.mxu0 }
  0xfa   : > { %v575_v60 = vadd.f32 %v574_v59, %v389_v46  ;;  %v588_v62 = vpop.f32.mrf.mxu1 }
  0xfc   : > { %v589_v63 = vadd.f32 %v588_v62, %v575_v60 }
  0xfe   : > { %v1387_v4 = vpop.eup %1386  ;;  %v1171_v5 = vmul.f32 -1.442695, %v589_v63  ;;  %v600_v40 = vpop.f32.mrf.mxu2 }
  0xff   : > { %v625_v7 = vadd.f32 1.0, %v1387_v4  ;;  %v614_v42 = vpop.f32.mrf.mxu3  ;;  %v601_v43 = vadd.f32 %v600_v40, %v390_v41 }
 0x100   : > { %1388 = vpow2.f32 %v1171_v5 }
 0x101   : > { %1390 = vrcp.f32 %v625_v7  ;;  %v638_v14 = vand.u32 2147483648, %v625_v7  ;;  %v636_v16 = vand.u32 2147483647, %v625_v7  ;;  %vm632_vm1 = vweird.f32 %v625_v7 }
 0x102   : > { %v615_v45 = vadd.f32 %v614_v42, %v601_v43 }
 0x103   : > { %v639_v20 = vor.u32 1.1754944e-38, %v638_v14  ;;  %vm637_vm3 = vcmp.eq.f32.partialorder %v636_v16, 8.507059e+37 }
 0x104   : > { %v1172_v47 = vmul.f32 -1.442695, %v615_v45 }
 0x106   : > { %v1389_v9 = vpop.eup %1388  ;;  %v602_v46 = vpop.f32.mrf.mxu2 }
 0x107   : > { %v1391_v10 = vpop.eup %1390  ;;  %v626_v11 = vadd.f32 1.0, %v1389_v9  ;;  %v603_v48 = vadd.f32 %v602_v46, %v390_v41  ;;  %v616_v49 = vpop.f32.mrf.mxu3 }
 0x108   : > { %v628_v12 = vmul.f32 %v1391_v10, %v625_v7  ;;  %vm633_vm0 = vweird.f32 %v1391_v10 }
 0x109   : > { %1392 = vrcp.f32 %v626_v11  ;;  %vm634_vm2 = vmor %vm632_vm1, %vm633_vm0  ;;  %v653_v26 = vand.u32 2147483648, %v626_v11  ;;  %v651_v29 = vand.u32 2147483647, %v626_v11  ;;  %vm647_vm5 = vweird.f32 %v626_v11 }
 0x10a   : > { %v629_v13 = vsub.f32 1.0, %v628_v12  ;;  %1394 = vpow2.f32 %v1172_v47  ;;  %v617_v50 = vadd.f32 %v616_v49, %v603_v48 }
 0x10b   : > { %v654_v32 = vor.u32 1.1754944e-38, %v653_v26  ;;  %vm652_vm7 = vcmp.eq.f32.partialorder %v651_v29, 8.507059e+37 }
 0x10c   : > { %v630_v15 = vmul.f32 %v1391_v10, %v629_v13  ;;  %v1173_v51 = vmul.f32 -1.442695, %v617_v50 }
 0x10e   : > { %v631_v17 = vadd.f32 %v1391_v10, %v630_v15  ;;  %1396 = vpow2.f32 %v1173_v51 }
 0x10f   : > { %v1393_v18 = vpop.eup %1392 }
 0x110   : > { %v635_v21 = vsel %vm634_vm2, %v1391_v10, %v631_v17  ;;  %v643_v22 = vmul.f32 %v1393_v18, %v626_v11  ;;  %vm648_vm4 = vweird.f32 %v1393_v18  ;;  %v1395_v52 = vpop.eup %1394 }
 0x111   : > { %v640_v23 = vsel %vm637_vm3, %v639_v20, %v635_v21  ;;  %vm649_vm6 = vmor %vm647_vm5, %vm648_vm4  ;;  %v663_v53 = vadd.f32 1.0, %v1395_v52 }
 0x112   : > { %v697_v24 = vmul.f32 %v640_v23, %v1817_v19  ;;  %v644_v25 = vsub.f32 1.0, %v643_v22  ;;  %v856_v58 = vpop.f32.mrf.mxu0 }
 0x113   : > { %1398 = vrcp.f32 %v663_v53  ;;  %v857_v61 = vadd.f32 %v1385_v44, %v856_v58  ;;  %vm670_vm8 = vweird.f32 %v663_v53  ;;  %v676_v2 = vand.u32 2147483648, %v663_v53 }
 0x114   : > { %v699_v27 = vpack.c.bf16 %v697_v24, %v697_v24  ;;  %v645_v28 = vmul.f32 %v1393_v18, %v644_v25  ;;  %v1397_v54 = vpop.eup %1396  ;;  %v674_v6 = vand.u32 2147483647, %v663_v53 }
 0x115   : > { %v664_v55 = vadd.f32 1.0, %v1397_v54  ;;  %v677_v8 = vor.u32 1.1754944e-38, %v676_v2 }
 0x116   : > { %701 = vst [vmem:[#allocation2 + $0x4] sm:$0xf] %v699_v27  ;;  %v646_v30 = vadd.f32 %v1393_v18, %v645_v28  ;;  %vm675_vm11 = vcmp.eq.f32.partialorder %v674_v6, 8.507059e+37 }
 0x117   : > { %1400 = vrcp.f32 %v664_v55  ;;  %vm685_vm12 = vweird.f32 %v664_v55  ;;  %v691_v15 = vand.u32 2147483648, %v664_v55  ;;  %v689_v20 = vand.u32 2147483647, %v664_v55 }
 0x118   : > { %v650_v33 = vsel %vm649_vm6, %v1393_v18, %v646_v30 }
 0x119   : > { %v655_v34 = vsel %vm652_vm7, %v654_v32, %v650_v33  ;;  %v1399_v56 = vpop.eup %1398  ;;  %v692_v22 = vor.u32 1.1754944e-38, %v691_v15  ;;  %vm690_vm15 = vcmp.eq.f32.partialorder %v689_v20, 8.507059e+37 }
 0x11a   : > { %v698_v35 = vmul.f32 %v655_v34, %v1822_v31  ;;  %v666_v57 = vmul.f32 %v1399_v56, %v663_v53  ;;  %vm671_vm9 = vweird.f32 %v1399_v56  ;;  %v858_v4 = vpop.f32.mrf.mxu0 }
 0x11b   : > { %vm672_vm10 = vmor %vm670_vm8, %vm671_vm9  ;;  %v859_v7 = vadd.f32 %v1385_v44, %v858_v4 }
 0x11c   : > { %v700_v36 = vpack.c.bf16 %v698_v35, %v698_v35  ;;  %v667_v59 = vsub.f32 1.0, %v666_v57 }
 0x11d   : > { %v1288_v37 = vld [vmem:[#allocation2 + $0x4] sm:$0xf]  ;;  %v1401_v60 = vpop.eup %1400 }
 0x11e   : > { %702 = vst [vmem:[#allocation2 + $0xc] sm:$0xf] %v700_v36  ;;  %v668_v62 = vmul.f32 %v1399_v56, %v667_v59  ;;  %v681_v63 = vmul.f32 %v1401_v60, %v664_v55  ;;  %vm686_vm13 = vweird.f32 %v1401_v60 }
 0x11f   : > { %vm687_vm14 = vmor %vm685_vm12, %vm686_vm13 }
 0x120   : > { %v682_v3 = vsub.f32 1.0, %v681_v63  ;;  %v669_v5 = vadd.f32 %v1399_v56, %v668_v62 }
 0x122   : > { %v683_v9 = vmul.f32 %v1401_v60, %v682_v3  ;;  %v673_v10 = vsel %vm672_vm10, %v1399_v56, %v669_v5 }
 0x123   : > { %v678_v16 = vsel %vm675_vm11, %v677_v8, %v673_v10 }
 0x124   : > { %v684_v18 = vadd.f32 %v1401_v60, %v683_v9 }
 0x125   : > { %v1178_v38 = vld [vmem:[#allocation2 + $0x8] sm:$0xf0] }
 0x126   : > { %v1181_v39 = vor.u32 %v1288_v37, %v1178_v38  ;;  %v688_v23 = vsel %vm687_vm14, %v1401_v60, %v684_v18 }
 0x127   : > { %v693_v25 = vsel %vm690_vm15, %v692_v22, %v688_v23 }
 0x128   : > { %869 = vmatmul.bf16.vlgmr.msrb.gmra.mxu1 %v1181_v39 }
 0x1a5   : > { %v870_v0 = vpop.f32.mrf.mxu1 }
 0x1a6   : > { %v871_v1 = vadd.f32 %v870_v0, %v857_v61 }
 0x1a8   : > { %1402 = vtanh.f32 %v871_v1 }
 0x1ad   : > { %v872_v11 = vpop.f32.mrf.mxu1 }
 0x1ae   : > { %v1403_v12 = vpop.eup %1402  ;;  %v873_v13 = vadd.f32 %v872_v11, %v859_v7 }
 0x1af   : > { %v877_v14 = vsub.f32 %v1817_v19, %v1403_v12 }
 0x1b0   : > { %1404 = vtanh.f32 %v873_v13 }
 0x1b1   : > { %v879_v17 = vmul.f32 %v877_v14, %v678_v16 }
 0x1b3   : > { %v881_v21 = vadd.f32 %v1403_v12, %v879_v17 }
 0x1b5   : > { %883 = vst [vmem:[%s347_s30] sm:$0xff] %v881_v21 }
 0x1b6   : > { %v1405_v19 = vpop.eup %1404 }
 0x1b7   : > { %v878_v24 = vsub.f32 %v1822_v31, %v1405_v19 }
 0x1b9   : > { %v880_v26 = vmul.f32 %v878_v24, %v693_v25 }
 0x1bb   : > { %v882_v27 = vadd.f32 %v1405_v19, %v880_v26 }
 0x1bd   : > { %884 = vst [vmem:[%s347_s30 + $0x8] sm:$0xff] %v882_v27 }
 0x1be   : > { %1553 = shalt.err (!%p1550_p11)
}
 0x1bf   : > { %s1612_s10 = smov 128   ;;  %s1613_s19 = smov 8  }
 0x1c0   : > { %1319 = dma.vmem_to_hbm [thread:$0]  (%p1721_p5), %s899_s12, 256, %s901_s17, %s886_s25, %s1612_s10, %s1612_s10, %s1613_s19  }
 0x1c1 PF: > { %s915_s27 = sand.u32 1, %s1592_s21   ;;  %p1892_p12 = scmp.ge.s32.totalorder %s1604_s24, 2 }
 0x1c2   : > { %s916_s26 = scalar_lea.sflag [#allocation5], %s915_s27 }
 0x1c3   : > { %p1336_p13 = pnand %p1892_p12, %p1684_p6 }
 0x1c5   : > { %p1337_p0 = pneg %p1336_p13 }
 0x1c7   : > { %1587 = dma.done.wait (%p1337_p0), %s916_s26, 256  }
 0x1c8   : > { %1589 = vsyncadd (%p1337_p0), %s916_s26, 4294967040  ;;  %s1893_s15 = sld [smem:[#allocation17_spill]]  ;;  %p23_p3 = scmp.ge.s32.totalorder %s1708_s20, 4  }
 0x1c9   : > { %s1894_s23 = sld [smem:[#allocation18_spill]]  ;;  %s1895_s21 = smov %s1596_s22 }
 0x1ca   : > { %s1897_s24 = smov %s1708_s20  ;;  %25 = sbr.rel (!%p23_p3) target bundleno = 12 (0xc), region = 110 }
 0x1ce   : > { %s1896_s22 = smov %s1893_s15 }
 0x1cf   :  { %922 = vsyncpa [#allocation4], 1 }
 0x1d0   :  { %924 = vsyncpa [#allocation4 + $0x1], 1 }
 0x1d1   :  { %925 = vsyncpa [#allocation7], 1 }
 0x1d2   :  { %927 = vsyncpa [#allocation7 + $0x1], 1 }
 0x1d3   :  { %928 = vsyncpa [#allocation10], 1 }
 0x1d4   :  { %929 = vsyncpa [#allocation5], 1 }
 0x1d5   :  { %931 = vsyncpa [#allocation5 + $0x1], 1 }

</bundles_post_ra>
